<compile_context>
chip_gen: v6e
topology: v6e:2x2x1
jax: 0.10.0
libtpu: 0.0.40
codegen_flags: <defaults>
</compile_context>

<pallas_src>
import math

import jax
import jax.numpy as jnp
from jax.experimental import pallas as pl
from jax.experimental.pallas import tpu as pltpu


def _mul_kernel(x_ref, w_ref, o_ref):
    # x_ref: (tr, tl), w_ref: (1, tl) -> broadcast multiply on the VPU.
    o_ref[...] = x_ref[...] * w_ref[...]


def mul_forward(x, weight, *, target_block_bytes=2 << 20):
    """x: (..., dim) array, weight: (dim,) array. Returns x * weight."""
    dim = weight.shape[0]
    assert x.shape[-1] == dim, "last axis of x must equal dim"

    # torch-style promotion: compute and return in the promoted dtype.
    out_dtype = jnp.promote_types(x.dtype, weight.dtype)
    x = x.astype(out_dtype)
    w = weight.astype(out_dtype)

    orig_shape = x.shape
    itemsize = jnp.dtype(out_dtype).itemsize
    # Sublane packing: 8 rows for 4-byte, 16 for 2-byte, 32 for 1-byte dtypes.
    sublane = max(8, 32 // itemsize)
    total = x.size

    # ---- choose lane width L (last axis of the 2-D view) ---------------------
    if dim % 128 == 0:
        L = dim
        w_row = w
    else:
        # Lane-dense repack: fold the contiguous stream into rows of
        # L = lcm(dim, 128) and tile the weight to match (element at flat index
        # f has weight index f % dim, and f % dim == col % dim since dim | L).
        L_lcm = dim * 128 // math.gcd(dim, 128)
        if total % L_lcm == 0 and L_lcm * itemsize * sublane <= target_block_bytes:
            L = L_lcm
            w_row = jnp.tile(w, L // dim)
        else:
            # Fallback: keep (rows, dim) layout (partial-lane masked stores).
            L = dim
            w_row = w

    x_flat = x.reshape(-1, L)
    rows = x_flat.shape[0]
    w2d = w_row.reshape(1, L)

    # ---- lane tile: column-block very wide rows so blocks stay bounded -------
    if L % 128 == 0 and L * itemsize * sublane > target_block_bytes:
        tl = max(128, (target_block_bytes // (itemsize * sublane)) // 128 * 128)
        tl = min(tl, L)
    else:
        tl = L

    # ---- row tile: ~target_block_bytes per block, multiple of sublane --------
    tr = max(sublane, target_block_bytes // max(1, tl * itemsize))
    tr = (tr // sublane) * sublane
    rows_up = ((rows + sublane - 1) // sublane) * sublane
    tr = max(sublane, min(tr, rows_up))

    grid = (pl.cdiv(rows, tr), pl.cdiv(L, tl))

    # VMEM budget: double-buffered input + double-buffered output + weight row.
    block_bytes = tr * tl * itemsize
    vmem_needed = 4 * block_bytes + 2 * L * itemsize + (1 << 20)
    compiler_kwargs = dict(dimension_semantics=("parallel", "parallel"))
    if vmem_needed > (16 << 20):
        # Only raise the scoped limit when the requested tiles actually need it
        # (caps at v7x's 64 MiB physical VMEM).
        compiler_kwargs["vmem_limit_bytes"] = min(vmem_needed, 64 << 20)

    cost = pl.CostEstimate(
        flops=total,
        transcendentals=0,
        bytes_accessed=2 * total * itemsize + L * itemsize,
    )

    out = pl.pallas_call(
        _mul_kernel,
        out_shape=jax.ShapeDtypeStruct((rows, L), out_dtype),
        grid_spec=pltpu.PrefetchScalarGridSpec(
            num_scalar_prefetch=0,
            grid=grid,
            in_specs=[
                pl.BlockSpec((tr, tl), lambda i, j: (i, j)),
                pl.BlockSpec((1, tl), lambda i, j: (0, j)),
            ],
            out_specs=pl.BlockSpec((tr, tl), lambda i, j: (i, j)),
        ),
        compiler_params=pltpu.CompilerParams(**compiler_kwargs),
        cost_estimate=cost,
    )(x_flat, w2d)

    return out.reshape(orig_shape)


if __name__ == "__main__":
    # Module config (synthetic, deterministic init):
    dim = 32
    alpha_init = 1.0
    # weight.fill_(alpha_init); add a small deterministic perturbation so the
    # multiply is visible in the check.
    weight = jnp.full((dim,), alpha_init, dtype=jnp.float32) + \
        0.01 * jnp.arange(dim, dtype=jnp.float32)

    # Example input: (batch=2, seq=8, hidden=dim)
    key = jax.random.PRNGKey(0)
    x = jax.random.normal(key, (2, 8, dim), dtype=jnp.float32)

    y = mul_forward(x, weight)
    y = jax.block_until_ready(y)

    # Reference check against plain JAX broadcasting (mirrors torch semantics).
    y_ref = x * weight
    assert y.shape == x.shape
    assert y.dtype == y_ref.dtype
    assert jnp.allclose(y, y_ref, atol=1e-6), "mismatch vs reference"

    print("KERNEL_OK")
</pallas_src>

<mosaic_0001>
module attributes {stable_mosaic.version = 11 : i64} {
  func.func @_mul_kernel(%arg0: i32, %arg1: i32, %arg2: memref<8x128xf32, #tpu.memory_space<vmem>>, %arg3: memref<1x128xf32, #tpu.memory_space<vmem>>, %arg4: memref<8x128xf32, #tpu.memory_space<vmem>>) attributes {dimension_semantics = [#tpu.dimension_semantics<parallel>, #tpu.dimension_semantics<parallel>], iteration_bounds = array<i64: 1, 1>, scalar_prefetch = 0 : i64, scratch_operands = 0 : i64, tpu.core_type = #tpu.core_type<tc>, window_params = [{transform_indices = @transform_0, window_bounds = array<i64: 8, 128>}, {transform_indices = @transform_1, window_bounds = array<i64: 1, 128>}, {transform_indices = @transform_2, window_bounds = array<i64: 8, 128>}]} {
    %c0 = arith.constant 0 : index
    %c0_0 = arith.constant 0 : index
    %0 = vector.load %arg2[%c0, %c0_0] : memref<8x128xf32, #tpu.memory_space<vmem>>, vector<8x128xf32>
    %c0_1 = arith.constant 0 : index
    %c0_2 = arith.constant 0 : index
    %1 = vector.load %arg3[%c0_1, %c0_2] : memref<1x128xf32, #tpu.memory_space<vmem>>, vector<1x128xf32>
    %2 = vector.broadcast %1 : vector<1x128xf32> to vector<8x128xf32>
    %3 = arith.mulf %0, %2 : vector<8x128xf32>
    %c0_3 = arith.constant 0 : index
    %c0_4 = arith.constant 0 : index
    %4 = vector.load %arg4[%c0_3, %c0_4] : memref<8x128xf32, #tpu.memory_space<vmem>>, vector<8x128xf32>
    tpu.vector_store %arg4[%c0_3, %c0_4], %3 {strides = array<i32>} : memref<8x128xf32, #tpu.memory_space<vmem>>, vector<8x128xf32>,
    return
  }
  func.func @transform_0(%arg0: i32, %arg1: i32) -> (i32, i32) {
    %c0_i32 = arith.constant 0 : i32
    return %arg0, %arg1 : i32, i32
  }
  func.func @transform_1(%arg0: i32, %arg1: i32) -> (i32, i32) {
    %c0_i32 = arith.constant 0 : i32
    %c0_i32_0 = arith.constant 0 : i32
    return %c0_i32, %arg1 : i32, i32
  }
  func.func @transform_2(%arg0: i32, %arg1: i32) -> (i32, i32) {
    %c0_i32 = arith.constant 0 : i32
    return %arg0, %arg1 : i32, i32
  }
}

</mosaic_0001>

<bundles_post_ra>
// kernel: tpu_custom_call.1
= control target key start
LH: loop header
LB: loop body
LE: loop exit
PB: predicated region body
PF: predicated region fallthrough
CT: control target
= control target key end

     0   :  { %7 = vsyncpa [#allocation3], 0  ;;  %s130_s0 = inlined_call_operand.hbm [shape: f32[4,128], index: 0, kind: input, shape index: {}]   ;;  %s131_s1 = inlined_call_operand.vmem [shape: f32[1,128], index: 1, kind: input, shape index: {}]   ;;  %s132_s2 = inlined_call_operand.hbm [shape: f32[4,128], index: 2, kind: output, shape index: {}]  }
   0x1   :  { %8 = vsyncpa [#allocation4], 0 }
   0x2   :  { %13 = vsyncadd [#allocation3], 64  ;;  %s102_s9 = smov [#allocation2]  }
   0x3   :  { %s14_s10 = sshll.u32 %s102_s9, 4  ;;  %s15_s10 = int_to_ptr.vmem [resolvable:$true] %s14_s10 }
   0x4   :  { %s66_s11 = scalar_lea.vmem %s15_s10, 64  ;;  %s70_s12 = scalar_lea.vmem %s15_s10, 128 }
   0x5   :  { %p67_p0 = scmp.ne.s32.totalorder %s15_s10, %s66_s11  ;;  %p71_p1 = scmp.lt.s32.totalorder %s15_s10, %s15_s10 }
   0x6   :  { %p72_p2 = scmp.lt.s32.totalorder %s70_s12, %s66_s11 }
   0x8   :  { %p73_p3 = por %p72_p2, %p71_p1 }
   0xa   :  { %p74_p4 = pnand %p73_p3, %p67_p0 }
   0xc   :  { %77 = shalt.err (!%p74_p4)
}
   0xd   :  { %s103_s13 = smov 64   ;;  %s104_s14 = smov 4  }
   0xe   :  { %20 = dma.hbm_to_vmem [thread:$0]  %s130_s0, 64, %s15_s10, [#allocation3], %s103_s13, %s103_s13, %s104_s14  }
   0xf   :  { %98 = dma.done.wait [#allocation3], 128  }
  0x10   :  { %99 = vsyncadd [#allocation3], 4294967168  ;;  %v26_v0 = vld [vmem:[#allocation2] sm:$0xff] }
  0x11   :  { %v53_v1 = vld [vmem:[%s131_s1] ss:$0 sm:$0xff] }
  0x12   :  { %v34_v2 = vmul.f32 %v53_v1, %v26_v0 }
  0x14   :  { %35 = vst [vmem:[#allocation5] sm:$0xff] %v34_v2 }
  0x15   :  { %40 = vsyncadd [#allocation4], 64  ;;  %s105_s19 = smov [#allocation5]  }
  0x16   :  { %s41_s20 = sshll.u32 %s105_s19, 4  ;;  %s42_s20 = int_to_ptr.vmem [resolvable:$true] %s41_s20 }
  0x17   :  { %s78_s21 = scalar_lea.vmem %s42_s20, 64  ;;  %s82_s22 = scalar_lea.vmem %s42_s20, 128 }
  0x18   :  { %p79_p5 = scmp.ne.s32.totalorder %s42_s20, %s78_s21  ;;  %p83_p6 = scmp.lt.s32.totalorder %s42_s20, %s42_s20 }
  0x19   :  { %p84_p7 = scmp.lt.s32.totalorder %s82_s22, %s78_s21 }
  0x1b   :  { %p85_p8 = por %p84_p7, %p83_p6 }
  0x1d   :  { %p86_p9 = pnand %p85_p8, %p79_p5 }
  0x1f   :  { %89 = shalt.err (!%p86_p9)
}
  0x20   :  { %47 = dma.vmem_to_hbm [thread:$0]  %s42_s20, 64, %s132_s2, [#allocation4], %s103_s13, %s103_s13, %s104_s14  }
  0x21   :  { %100 = dma.done.wait [#allocation4], 128  }
  0x22   :  { %101 = vsyncadd [#allocation4], 4294967168 }
  0x23   :  { %51 = vsyncpa [#allocation3], 1 }
  0x24   :  { %52 = vsyncpa [#allocation4], 1 }

</bundles_post_ra>
